<compile_context>
chip_gen: v7x
topology: tpu7x:2x2x1
jax: 0.10.0
libtpu: 0.0.40
codegen_flags: <defaults>
</compile_context>

<pallas_src>
import functools
import math

import jax
import jax.numpy as jnp
from jax.experimental import pallas as pl
from jax.experimental.pallas import tpu as pltpu

INPUT_DIM = 64
HIDDEN_DIMS = [32, 32]
OUTPUT_DIM = 1


def mlp_kernel(x_ref, w1_ref, b1_ref, w2_ref, b2_ref, w3_ref, b3_ref, o_ref):
    # Layer 1: (tm, 64) @ (64, 32) + (1, 32) -> ReLU          (MXU + VPU)
    h1 = jnp.dot(x_ref[...], w1_ref[...], preferred_element_type=jnp.float32)
    h1 = jnp.maximum(h1 + b1_ref[...], 0.0)
    # Layer 2: (tm, 32) @ (32, 32) + (1, 32) -> ReLU          (MXU + VPU)
    h2 = jnp.dot(h1, w2_ref[...], preferred_element_type=jnp.float32)
    h2 = jnp.maximum(h2 + b2_ref[...], 0.0)
    # Layer 3 (output_dim == 1): VPU multiply + XLU transpose + sublane reduce.
    # w3_ref is the weight row (1, 32); result is a lane-dense (1, tm) strip.
    # Final nonlinearity is Identity.
    prod_t = jnp.transpose(h2 * w3_ref[...])                       # (32, tm)
    row = jnp.sum(prod_t, axis=0, keepdims=True) + b3_ref[...]     # (1, tm)
    o_ref[...] = row.astype(o_ref.dtype)


@functools.partial(jax.jit, static_argnames=("tm",))
def mlp_forward(x, w1, b1, w2, b2, w3, b3, *, tm=512):
    """Fused MLP forward.

    x : (B, 64)   w1: (64, 32) b1: (1, 32)
                  w2: (32, 32) b2: (1, 32)
                  w3: (32, 1)  b3: (1, 1)
    Returns (B, 1).
    """
    B, D = x.shape
    # Keep tm a multiple of 8 (sublane alignment) when tiling is needed.
    tm = max(8, (tm // 8) * 8)
    # If the whole batch fits in one tile, take it (block == full array is legal);
    # otherwise B > tm guarantees cdiv(B, tm) >= 2 grid steps (both v7x TCs busy).
    tm_eff = B if B <= tm else tm
    num_tiles = pl.cdiv(B, tm_eff)

    w3_row = w3.reshape(1, HIDDEN_DIMS[-1])  # (1, 32): row layout for the VPU path

    rep = lambda i: (0, 0)  # weights/biases: constant block index -> stay resident

    out3d = pl.pallas_call(
        mlp_kernel,
        out_shape=jax.ShapeDtypeStruct((num_tiles, 1, tm_eff), x.dtype),
        grid_spec=pltpu.PrefetchScalarGridSpec(
            num_scalar_prefetch=0,
            grid=(num_tiles,),
            in_specs=[
                pl.BlockSpec((tm_eff, D), lambda i: (i, 0)),
                pl.BlockSpec(w1.shape, rep),
                pl.BlockSpec(b1.shape, rep),
                pl.BlockSpec(w2.shape, rep),
                pl.BlockSpec(b2.shape, rep),
                pl.BlockSpec(w3_row.shape, rep),
                pl.BlockSpec(b3.shape, rep),
            ],
            # Lane-dense output block: kernel sees (1, tm_eff) after squeezing the
            # gridded leading dim.
            out_specs=pl.BlockSpec((None, 1, tm_eff), lambda i: (i, 0, 0)),
        ),
        compiler_params=pltpu.CompilerParams(
            dimension_semantics=("parallel",),
        ),
    )(x, w1, b1, w2, b2, w3_row, b3)

    # (num_tiles, 1, tm) lane-dense slab -> (B, 1), dropping padded tail rows.
    return out3d.reshape(num_tiles * tm_eff)[:B].reshape(B, OUTPUT_DIM)


def init_linear_params(key, fan_in, fan_out, dtype=jnp.float32):
    # Matches torch.nn.Linear default init: U(-1/sqrt(fan_in), 1/sqrt(fan_in))
    kw, kb = jax.random.split(key)
    bound = 1.0 / math.sqrt(fan_in)
    w = jax.random.uniform(kw, (fan_in, fan_out), dtype, minval=-bound, maxval=bound)
    b = jax.random.uniform(kb, (1, fan_out), dtype, minval=-bound, maxval=bound)
    return w, b


if __name__ == "__main__":
    key = jax.random.PRNGKey(0)
    kx, k1, k2, k3 = jax.random.split(key, 4)

    w1, b1 = init_linear_params(k1, INPUT_DIM, HIDDEN_DIMS[0])
    w2, b2 = init_linear_params(k2, HIDDEN_DIMS[0], HIDDEN_DIMS[1])
    w3, b3 = init_linear_params(k3, HIDDEN_DIMS[1], OUTPUT_DIM)

    def reference(x):
        h = jnp.maximum(x @ w1 + b1, 0.0)
        h = jnp.maximum(h @ w2 + b2, 0.0)
        return h @ w3 + b3

    # Exercise: multi-tile, ragged last tile, and tiny single-tile (tm_eff == B).
    for batch, tm in ((256, 128), (200, 128), (8, 512)):
        kb = jax.random.fold_in(kx, batch)
        x = jax.random.normal(kb, (batch, INPUT_DIM), jnp.float32)
        out = jax.block_until_ready(mlp_forward(x, w1, b1, w2, b2, w3, b3, tm=tm))
        ref = reference(x)
        assert out.shape == (batch, OUTPUT_DIM), out.shape
        assert jnp.allclose(out, ref, atol=1e-5, rtol=1e-5), f"mismatch at batch={batch}"

    print("KERNEL_OK")
</pallas_src>

<mosaic_0001>
module attributes {stable_mosaic.version = 11 : i64} {
  func.func @mlp_kernel(%arg0: i32, %arg1: memref<128x64xf32, #tpu.memory_space<vmem>>, %arg2: memref<64x32xf32, #tpu.memory_space<vmem>>, %arg3: memref<1x32xf32, #tpu.memory_space<vmem>>, %arg4: memref<32x32xf32, #tpu.memory_space<vmem>>, %arg5: memref<1x32xf32, #tpu.memory_space<vmem>>, %arg6: memref<1x32xf32, #tpu.memory_space<vmem>>, %arg7: memref<1x1xf32, #tpu.memory_space<vmem>>, %arg8: memref<1x1x128xf32, #tpu.memory_space<vmem>>) attributes {dimension_semantics = [#tpu.dimension_semantics<parallel>], iteration_bounds = array<i64: 2>, scalar_prefetch = 0 : i64, scratch_operands = 0 : i64, tpu.core_type = #tpu.core_type<tc>, window_params = [{transform_indices = @transform_0, window_bounds = array<i64: 128, 64>}, {pipeline_mode = #tpu.pipeline_mode<synchronous>, transform_indices = @transform_1, window_bounds = array<i64: 64, 32>}, {pipeline_mode = #tpu.pipeline_mode<synchronous>, transform_indices = @transform_2, window_bounds = array<i64: 1, 32>}, {pipeline_mode = #tpu.pipeline_mode<synchronous>, transform_indices = @transform_3, window_bounds = array<i64: 32, 32>}, {pipeline_mode = #tpu.pipeline_mode<synchronous>, transform_indices = @transform_4, window_bounds = array<i64: 1, 32>}, {pipeline_mode = #tpu.pipeline_mode<synchronous>, transform_indices = @transform_5, window_bounds = array<i64: 1, 32>}, {pipeline_mode = #tpu.pipeline_mode<synchronous>, transform_indices = @transform_6, window_bounds = array<i64: 1, 1>}, {transform_indices = @transform_7, window_bounds = array<i64: 1, 1, 128>}]} {
    %c0 = arith.constant 0 : index
    %c0_0 = arith.constant 0 : index
    %0 = vector.load %arg1[%c0, %c0_0] : memref<128x64xf32, #tpu.memory_space<vmem>>, vector<128x64xf32>
    %c0_1 = arith.constant 0 : index
    %c0_2 = arith.constant 0 : index
    %1 = vector.load %arg2[%c0_1, %c0_2] : memref<64x32xf32, #tpu.memory_space<vmem>>, vector<64x32xf32>
    %cst = arith.constant dense<0.000000e+00> : vector<128x32xf32>
    %2 = tpu.matmul %0, %1, %cst {dimension_numbers = #tpu.dot_dimension_numbers<[1], [0], [0], [1], [0, 0, 1, 1], [], []>} : vector<128x64xf32>, vector<64x32xf32>, vector<128x32xf32> -> vector<128x32xf32>
    %c0_3 = arith.constant 0 : index
    %c0_4 = arith.constant 0 : index
    %3 = vector.load %arg3[%c0_3, %c0_4] : memref<1x32xf32, #tpu.memory_space<vmem>>, vector<1x32xf32>
    %4 = vector.broadcast %3 : vector<1x32xf32> to vector<128x32xf32>
    %5 = arith.addf %2, %4 : vector<128x32xf32>
    %cst_5 = arith.constant 0.000000e+00 : f32
    %6 = vector.broadcast %cst_5 : f32 to vector<128x32xf32>
    %7 = arith.maximumf %5, %6 : vector<128x32xf32>
    %c0_6 = arith.constant 0 : index
    %c0_7 = arith.constant 0 : index
    %8 = vector.load %arg4[%c0_6, %c0_7] : memref<32x32xf32, #tpu.memory_space<vmem>>, vector<32x32xf32>
    %cst_8 = arith.constant dense<0.000000e+00> : vector<128x32xf32>
    %9 = tpu.matmul %7, %8, %cst_8 {dimension_numbers = #tpu.dot_dimension_numbers<[1], [0], [0], [1], [0, 0, 1, 1], [], []>} : vector<128x32xf32>, vector<32x32xf32>, vector<128x32xf32> -> vector<128x32xf32>
    %c0_9 = arith.constant 0 : index
    %c0_10 = arith.constant 0 : index
    %10 = vector.load %arg5[%c0_9, %c0_10] : memref<1x32xf32, #tpu.memory_space<vmem>>, vector<1x32xf32>
    %11 = vector.broadcast %10 : vector<1x32xf32> to vector<128x32xf32>
    %12 = arith.addf %9, %11 : vector<128x32xf32>
    %cst_11 = arith.constant 0.000000e+00 : f32
    %13 = vector.broadcast %cst_11 : f32 to vector<128x32xf32>
    %14 = arith.maximumf %12, %13 : vector<128x32xf32>
    %c0_12 = arith.constant 0 : index
    %c0_13 = arith.constant 0 : index
    %15 = vector.load %arg6[%c0_12, %c0_13] : memref<1x32xf32, #tpu.memory_space<vmem>>, vector<1x32xf32>
    %16 = vector.broadcast %15 : vector<1x32xf32> to vector<128x32xf32>
    %17 = arith.mulf %14, %16 : vector<128x32xf32>
    %18 = tpu.transpose %17, [1, 0] : vector<128x32xf32> -> vector<32x128xf32>
    %cst_14 = arith.constant dense<0.000000e+00> : vector<128xf32>
    %19 = vector.multi_reduction <add>, %18, %cst_14 [0] : vector<32x128xf32> to vector<128xf32>
    %20 = vector.shape_cast %19 : vector<128xf32> to vector<1x128xf32>
    %c0_15 = arith.constant 0 : index
    %c0_16 = arith.constant 0 : index
    %21 = vector.load %arg7[%c0_15, %c0_16] : memref<1x1xf32, #tpu.memory_space<vmem>>, vector<1x1xf32>
    %22 = vector.broadcast %21 : vector<1x1xf32> to vector<1x128xf32>
    %23 = arith.addf %20, %22 : vector<1x128xf32>
    %c0_17 = arith.constant 0 : index
    %c0_18 = arith.constant 0 : index
    %c0_19 = arith.constant 0 : index
    %24 = vector.load %arg8[%c0_17, %c0_18, %c0_19] : memref<1x1x128xf32, #tpu.memory_space<vmem>>, vector<1x1x128xf32>
    %25 = vector.shape_cast %24 : vector<1x1x128xf32> to vector<1x128xf32>
    %26 = vector.shape_cast %23 : vector<1x128xf32> to vector<1x1x128xf32>
    tpu.vector_store %arg8[%c0_17, %c0_18, %c0_19], %26 {strides = array<i32>} : memref<1x1x128xf32, #tpu.memory_space<vmem>>, vector<1x1x128xf32>,
    return
  }
  func.func @transform_0(%arg0: i32) -> (i32, i32) {
    %c0_i32 = arith.constant 0 : i32
    %c0_i32_0 = arith.constant 0 : i32
    return %arg0, %c0_i32 : i32, i32
  }
  func.func @transform_1(%arg0: i32) -> (i32, i32) {
    %c0_i32 = arith.constant 0 : i32
    %c0_i32_0 = arith.constant 0 : i32
    %c0_i32_1 = arith.constant 0 : i32
    return %c0_i32, %c0_i32_0 : i32, i32
  }
  func.func @transform_2(%arg0: i32) -> (i32, i32) {
    %c0_i32 = arith.constant 0 : i32
    %c0_i32_0 = arith.constant 0 : i32
    %c0_i32_1 = arith.constant 0 : i32
    return %c0_i32, %c0_i32_0 : i32, i32
  }
  func.func @transform_3(%arg0: i32) -> (i32, i32) {
    %c0_i32 = arith.constant 0 : i32
    %c0_i32_0 = arith.constant 0 : i32
    %c0_i32_1 = arith.constant 0 : i32
    return %c0_i32, %c0_i32_0 : i32, i32
  }
  func.func @transform_4(%arg0: i32) -> (i32, i32) {
    %c0_i32 = arith.constant 0 : i32
    %c0_i32_0 = arith.constant 0 : i32
    %c0_i32_1 = arith.constant 0 : i32
    return %c0_i32, %c0_i32_0 : i32, i32
  }
  func.func @transform_5(%arg0: i32) -> (i32, i32) {
    %c0_i32 = arith.constant 0 : i32
    %c0_i32_0 = arith.constant 0 : i32
    %c0_i32_1 = arith.constant 0 : i32
    return %c0_i32, %c0_i32_0 : i32, i32
  }
  func.func @transform_6(%arg0: i32) -> (i32, i32) {
    %c0_i32 = arith.constant 0 : i32
    %c0_i32_0 = arith.constant 0 : i32
    %c0_i32_1 = arith.constant 0 : i32
    return %c0_i32, %c0_i32_0 : i32, i32
  }
  func.func @transform_7(%arg0: i32) -> (i32, i32, i32) {
    %c0_i32 = arith.constant 0 : i32
    %c0_i32_0 = arith.constant 0 : i32
    %c0_i32_1 = arith.constant 0 : i32
    return %arg0, %c0_i32, %c0_i32_0 : i32, i32, i32
  }
}

</mosaic_0001>

<bundles_post_ra>
// kernel: mlp_forward.1
= control target key start
LH: loop header
LB: loop body
LE: loop exit
PB: predicated region body
PF: predicated region fallthrough
CT: control target
= control target key end

     0   :  { %s1450_s0 = inlined_call_operand.vmem [shape: f32[256,64], index: 0, kind: input, shape index: {}]   ;;  %s1451_s1 = inlined_call_operand.vmem [shape: f32[64,32], index: 1, kind: input, shape index: {}]   ;;  %s1452_s2 = inlined_call_operand.vmem [shape: f32[1,32], index: 2, kind: input, shape index: {}]   ;;  %s1453_s3 = inlined_call_operand.vmem [shape: f32[32,32], index: 3, kind: input, shape index: {}]   ;;  %s1454_s4 = inlined_call_operand.vmem [shape: f32[1,32], index: 4, kind: input, shape index: {}]   ;;  %s1455_s5 = inlined_call_operand.vmem [shape: f32[1,32], index: 5, kind: input, shape index: {}]   ;;  %s1456_s6 = inlined_call_operand.<no memory space> [shape: f32[1,1], index: 6, kind: input, shape index: {}]   ;;  %s1457_s7 = inlined_call_operand.hbm [shape: f32[2,1,128], index: 7, kind: output, shape index: {}]  }
   0x1   :  { %v12_v0 = vstv %s1456_s6 }
   0x2   :  { %13 = vst [vmem:[#allocation2] sm:$0x1] %v12_v0 }
   0x3   :  { %14 = vsyncpa [#allocation4], 0 }
   0x4   :  { %16 = vsyncpa [#allocation4 + $0x1], 0  ;;  %s1220_s26 = smov 0   ;;  %s1222_s27 = smov 0  }
   0x5   :  { %s1224_s28 = smov 0   ;;  %s1226_s29 = smov 0  }
   0x6 LB: > { %s885_s6 = sadd.s32 4294967295, %s1173_s29   ;;  %s886_s30 = sadd.s32 4294967294, %s1173_s29   ;;  %s1173_s29 = sphi %s1226_s29, %s1463_s29   ;;  %s1169_s28 = sphi %s1224_s28, %s1462_s28   ;;  %s1165_s27 = sphi %s1222_s27, %s1461_s27   ;;  %s1161_s26 = sphi %s1220_s26, %s1460_s26  }
   0x7   : > { %s1243_s8 = sadd.s32 1, %s1173_s29   ;;  %s181_s9 = sadd.s32 1, %s1169_s28 }
   0x8   : > { %s178_s10 = ssub.s32 %s1173_s29, %s1243_s8  ;;  %p191_p0 = scmp.ne.s32.totalorder %s1169_s28, %s1165_s27 }
   0x9   : > { %p179_p1 = scmp.eq.s32.totalorder %s178_s10, 0  ;;  %p192_p2 = scmp.eq.s32.totalorder %s885_s6, 1 }
   0xa   : > { %p197_p3 = scmp.ne.s32.totalorder %s1165_s27, %s1161_s26  ;;  %p198_p4 = scmp.eq.s32.totalorder %s886_s30, 1 }
   0xb   : > { %s1253_s11 = scalar_select %p179_p1, %s1169_s28, %s181_s9  }
   0xc   : > { %p1255_p5 = por %p192_p2, %p191_p0  ;;  %p1259_p6 = por %p198_p4, %p197_p3 }
   0xd   : > { %p889_p7 = scmp.ge.s32.totalorder %s1173_s29, 1  ;;  %p243_p8 = scmp.lt.s32.totalorder %s1173_s29, 3 }
   0xf   : > { %p244_p9 = pnand %p889_p7, %p243_p8 }
  0x10   : > { %v296_v1 = vld [vmem:[%s1451_s1] sm:$0xff] (!%p244_p9)  ;;  %v297_v2 = vld [vmem:[%s1451_s1 + $0x8] sm:$0xff] (!%p244_p9)  ;;  %v298_v3 = vld [vmem:[%s1451_s1 + $0x10] sm:$0xff] (!%p244_p9)  ;;  %s1274_s20 = sshll.u32 (!%p244_p9), %s885_s6, 4  ;;  %vm311_vm0 = vcmask (!%p244_p9), 523264   ;;  %v1175_v36 = vmov (!%p244_p9), 0  }
  0x11   : > { %247 = sbr.rel (%p244_p9) target bundleno = 643 (0x283), region = 48  ;;  %v1046_v4 = vpack.c.bf16 (!%p244_p9), %v297_v2, %v296_v1  ;;  %v299_v5 = vld [vmem:[%s1451_s1 + $0x18] sm:$0xff] (!%p244_p9)  ;;  %p275_p10 = scmp.lt.s32.totalorder (!%p244_p9), %s1274_s20, 31  ;;  %v300_v7 = vld [vmem:[%s1451_s1 + $0x20] sm:$0xff] (!%p244_p9)  ;;  %v301_v8 = vld [vmem:[%s1451_s1 + $0x28] sm:$0xff] (!%p244_p9)  ;;  %1110 = vset.pattern.permute.xlu0 (!%p244_p9), %v1175_v36  ;;  %vm532_vm1 = vcmask (!%p244_p9), 261120  }
  0x12   : > { %v1050_v6 = vpack.c.bf16 (!%p244_p9), %v299_v5, %v298_v3  ;;  %v521_v9 = vld [vmem:[%s1453_s3] sm:$0xff] (!%p244_p9)  ;;  %v522_v10 = vld [vmem:[%s1453_s3 + $0x8] sm:$0xff] (!%p244_p9)  ;;  %v1054_v12 = vpack.c.bf16 (!%p244_p9), %v301_v8, %v300_v7  ;;  %v302_v13 = vld [vmem:[%s1451_s1 + $0x30] sm:$0xff] (!%p244_p9)  ;;  %s272_s19 = sand.u32 (!%p244_p9), 1, %s1165_s27   ;;  %s1408_s25 = scalar_lea.hbm (!%p244_p9), %s1457_s7, %s1274_s20 }
  0x13   : > { %1047 = vmatprep.subr.bf16.mxu0 (!%p244_p9), %v1046_v4  ;;  %v1062_v11 = vpack.c.bf16 (!%p244_p9), %v522_v10, %v521_v9  ;;  %v303_v14 = vld [vmem:[%s1451_s1 + $0x38] sm:$0xff] (!%p244_p9)  ;;  %v523_v32 = vld [vmem:[%s1453_s3 + $0x10] sm:$0xff] (!%p244_p9)  ;;  %v806_v35 = vld [vmem:[#allocation2] sm:$0x1] (!%p244_p9)  ;;  %s273_s21 = scalar_lea.vmem (!%p244_p9), [#allocation3], %s272_s19  ;;  %s819_s30 = scalar_lea.sflag (!%p244_p9), [#allocation4], %s272_s19 }
  0x14   : > { %1049 = vmatpush3.bf16.msra.mxu0 (!%p244_p9), %v1046_v4  ;;  %v1058_v16 = vpack.c.bf16 (!%p244_p9), %v303_v14, %v302_v13  ;;  %v524_v33 = vld [vmem:[%s1453_s3 + $0x18] sm:$0xff] (!%p244_p9)  ;;  %809 = vperm.xlu0 (!%p244_p9), %1110, %v806_v35   ;;  %v892_v37 = vld [vmem:[%s1452_s2] ss:$0 sm:$0xff] (!%p244_p9)  ;;  %s831_s22 = sshll.u32 (!%p244_p9), %s273_s21, 4  ;;  %s1176_s6 = smov (!%p244_p9), [#allocation3]   ;;  %s1410_s22 = int_to_ptr.vmem [resolvable:$true] %s831_s22 }
  0x15   : > { %1051 = vmatprep.subr.bf16.mxu0 (!%p244_p9), %v1050_v6  ;;  %1063 = vmatprep.subr.bf16.mxu1 (!%p244_p9), %v1062_v11  ;;  %v1066_v34 = vpack.c.bf16 (!%p244_p9), %v524_v33, %v523_v32  ;;  %s1111_s9 = scalar_lea.vmem (!%p244_p9), %s1410_s22, 16 }
  0x16   : > { %1065 = vmatpush3.bf16.msra.mxu1 (!%p244_p9), %v1062_v11  ;;  %p1112_p11 = scmp.ne.s32.totalorder (!%p244_p9), %s1410_s22, %s1111_s9 }
  0x17   : > { %1067 = vmatprep.subr.bf16.mxu1 (!%p244_p9), %v1066_v34 }
  0x18   : > { %s276_s10 = scalar_select %p275_p10, %s1274_s20, 31  ;;  %1053 = vmatpush3.bf16.msra.mxu0 %v1050_v6 }
  0x19   : > { %1055 = vmatprep.subr.bf16.mxu0 %v1054_v12  ;;  %p1113_p12 = pnand %p1112_p11, %p1255_p5 }
  0x1a   : > { %s891_s16 = sshll.u32 %s276_s10, 3  ;;  %1069 = vmatpush3.bf16.msra.mxu1 %v1066_v34  ;;  %s1115_s10 = sshll.u32 %s1176_s6, 4  ;;  %s1116_s10 = int_to_ptr.vmem [resolvable:$false] %s1115_s10 }
  0x1b   : > { %s1302_s24 = scalar_lea.vmem %s1450_s0, %s891_s16  ;;  %p1114_p13 = pneg %p1113_p12 }
  0x1c   : > { %v280_v15 = vld [vmem:[%s1302_s24] sm:$0xff]  ;;  %1057 = vmatpush3.bf16.msra.mxu0 %v1054_v12  ;;  %v281_v17 = vld [vmem:[%s1302_s24 + $0x8] sm:$0xff]  ;;  %v282_v18 = vld [vmem:[%s1302_s24 + $0x10] sm:$0xff]  ;;  %s1117_s14 = scalar_lea.vmem %s1116_s10, 32  ;;  %p1118_p0 = scmp.lt.s32.totalorder %s1410_s22, %s1116_s10 }
  0x1d   : > { %990 = vmatprep.mubr.msk.f32.mxu0 %vm311_vm0, %v280_v15  ;;  %1059 = vmatprep.subr.bf16.mxu0 %v1058_v16  ;;  %v283_v19 = vld [vmem:[%s1302_s24 + $0x18] sm:$0xff]  ;;  %v284_v20 = vld [vmem:[%s1302_s24 + $0x20] sm:$0xff]  ;;  %v285_v21 = vld [vmem:[%s1302_s24 + $0x28] sm:$0xff]  ;;  %p1119_p1 = scmp.lt.s32.totalorder %s1117_s14, %s1111_s9 }
  0x1e   : > { %v286_v22 = vld [vmem:[%s1302_s24 + $0x30] sm:$0xff]  ;;  %v287_v23 = vld [vmem:[%s1302_s24 + $0x38] sm:$0xff]  ;;  %v288_v24 = vld [vmem:[%s1302_s24 + $0x40] sm:$0xff] }
  0x1f   : > { %v289_v25 = vld [vmem:[%s1302_s24 + $0x48] sm:$0xff]  ;;  %v290_v26 = vld [vmem:[%s1302_s24 + $0x50] sm:$0xff]  ;;  %v291_v27 = vld [vmem:[%s1302_s24 + $0x58] sm:$0xff]  ;;  %p1120_p2 = por %p1119_p1, %p1118_p0 }
  0x20   : > { %1061 = vmatpush3.bf16.msra.mxu0 %v1058_v16  ;;  %v292_v28 = vld [vmem:[%s1302_s24 + $0x60] sm:$0xff]  ;;  %v293_v29 = vld [vmem:[%s1302_s24 + $0x68] sm:$0xff]  ;;  %v294_v30 = vld [vmem:[%s1302_s24 + $0x70] sm:$0xff] }
  0x21   : > { %v295_v31 = vld [vmem:[%s1302_s24 + $0x78] sm:$0xff]  ;;  %p1121_p3 = pnand %p1120_p2, %p1114_p13 }
  0x23   : > { %991 = vmatmul.mubr.msk.f32.vlgmr.msra.gmra.mrb[0].mxu0 %vm311_vm0, %v281_v17 }
  0x24   : > { %993 = vmatprep.mubr.msk.f32.mxu0 %vm311_vm0, %v282_v18 }
  0x27   : > { %994 = vmatmul.mubr.msk.f32.gmra.mrb[2].mxu0 %vm311_vm0, %v283_v19 }
  0x28   : > { %996 = vmatprep.mubr.msk.f32.mxu0 %vm311_vm0, %v284_v20 }
  0x2b   : > { %997 = vmatmul.mubr.msk.f32.gmra.mrb[4].mxu0 %vm311_vm0, %v285_v21 }
  0x2c   : > { %999 = vmatprep.mubr.msk.f32.mxu0 %vm311_vm0, %v286_v22  ;;  %v1364_v22 = vld [vmem:[%s1454_s4] ss:$0 sm:$0xff] }
  0x2f   : > { %1000 = vmatmul.mubr.msk.f32.gmra.mrb[6].mxu0 %vm311_vm0, %v287_v23 }
  0x30   : > { %1002 = vmatprep.mubr.msk.f32.mxu0 %vm311_vm0, %v288_v24 }
  0x33   : > { %1003 = vmatmul.mubr.msk.f32.gmra.mrb[8].mxu0 %vm311_vm0, %v289_v25 }
  0x34   : > { %1005 = vmatprep.mubr.msk.f32.mxu0 %vm311_vm0, %v290_v26 }
  0x37   : > { %1006 = vmatmul.mubr.msk.f32.gmra.mrb[10].mxu0 %vm311_vm0, %v291_v27  ;;  %v1371_v27 = vld [vmem:[%s1455_s5] ss:$0 sm:$0xff] }
  0x38   : > { %1008 = vmatprep.mubr.msk.f32.mxu0 %vm311_vm0, %v292_v28 }
  0x3b   : > { %1009 = vmatmul.mubr.msk.f32.gmra.mrb[12].mxu0 %vm311_vm0, %v293_v29 }
  0x3c   : > { %1011 = vmatprep.mubr.msk.f32.mxu0 %vm311_vm0, %v294_v30 }
  0x3f   : > { %1012 = vmatmul.mubr.msk.f32.gmra.mrb[14].mxu0 %vm311_vm0, %v295_v31 }
  0xf6   : > { %v992_v38 = vpop.f32.mrb[0].mxu0 }
  0xf7   : > { %v432_v39 = vadd.f32 %v992_v38, %v892_v37  ;;  %v426_v40 = vpop.f32.mrb[1].mxu0 }
  0xf8   : > { %v427_v41 = vadd.f32 %v892_v37, %v426_v40 }
  0xf9   : > { %v506_v44 = vmax.f32 %v432_v39, 0.0 }
  0xfa   : > { %v505_v42 = vmax.f32 %v427_v41, 0.0  ;;  %v995_v43 = vpop.f32.mrb[2].mxu0 }
  0xfb   : > { %v442_v45 = vadd.f32 %v995_v43, %v892_v37  ;;  %v436_v46 = vpop.f32.mrb[3].mxu0 }
  0xfc   : > { %v437_v47 = vadd.f32 %v892_v37, %v436_v46  ;;  %1022 = vmatprep.mubr.msk.f32.mxu1 %vm532_vm1, %v505_v42 }
  0xfd   : > { %v508_v48 = vmax.f32 %v442_v45, 0.0  ;;  %1023 = vmatmul.mubr.msk.f32.vlgmr.msra.gmra.mrb[0].mxu1 %vm532_vm1, %v506_v44 }
  0xfe   : > { %v507_v49 = vmax.f32 %v437_v47, 0.0  ;;  %v998_v50 = vpop.f32.mrb[4].mxu0 }
  0xff   : > { %v452_v51 = vadd.f32 %v998_v50, %v892_v37  ;;  %v446_v52 = vpop.f32.mrb[5].mxu0 }
 0x100   : > { %1025 = vmatprep.mubr.msk.f32.mxu1 %vm532_vm1, %v507_v49  ;;  %v447_v53 = vadd.f32 %v892_v37, %v446_v52 }
 0x101   : > { %1026 = vmatmul.mubr.msk.f32.gmra.mrb[2].mxu1 %vm532_vm1, %v508_v48  ;;  %v510_v54 = vmax.f32 %v452_v51, 0.0 }
 0x102   : > { %v509_v55 = vmax.f32 %v447_v53, 0.0  ;;  %v1001_v56 = vpop.f32.mrb[6].mxu0 }
 0x103   : > { %v462_v57 = vadd.f32 %v1001_v56, %v892_v37  ;;  %v456_v58 = vpop.f32.mrb[7].mxu0 }
 0x104   : > { %1028 = vmatprep.mubr.msk.f32.mxu1 %vm532_vm1, %v509_v55  ;;  %v457_v59 = vadd.f32 %v892_v37, %v456_v58 }
 0x105   : > { %1029 = vmatmul.mubr.msk.f32.gmra.mrb[4].mxu1 %vm532_vm1, %v510_v54  ;;  %v512_v60 = vmax.f32 %v462_v57, 0.0 }
 0x106   : > { %v511_v61 = vmax.f32 %v457_v59, 0.0  ;;  %v1004_v62 = vpop.f32.mrb[8].mxu0 }
 0x107   : > { %v472_v63 = vadd.f32 %v1004_v62, %v892_v37  ;;  %v466_v0 = vpop.f32.mrb[9].mxu0 }
 0x108   : > { %1031 = vmatprep.mubr.msk.f32.mxu1 %vm532_vm1, %v511_v61  ;;  %v467_v1 = vadd.f32 %v892_v37, %v466_v0 }
 0x109   : > { %1032 = vmatmul.mubr.msk.f32.gmra.mrb[6].mxu1 %vm532_vm1, %v512_v60  ;;  %v514_v2 = vmax.f32 %v472_v63, 0.0 }
 0x10a   : > { %v513_v3 = vmax.f32 %v467_v1, 0.0  ;;  %v1007_v4 = vpop.f32.mrb[10].mxu0 }
 0x10b   : > { %v482_v5 = vadd.f32 %v1007_v4, %v892_v37  ;;  %v476_v6 = vpop.f32.mrb[11].mxu0 }
 0x10c   : > { %1034 = vmatprep.mubr.msk.f32.mxu1 %vm532_vm1, %v513_v3  ;;  %v477_v7 = vadd.f32 %v892_v37, %v476_v6 }
 0x10d   : > { %1035 = vmatmul.mubr.msk.f32.gmra.mrb[8].mxu1 %vm532_vm1, %v514_v2  ;;  %v516_v8 = vmax.f32 %v482_v5, 0.0 }
 0x10e   : > { %v515_v9 = vmax.f32 %v477_v7, 0.0  ;;  %v1010_v10 = vpop.f32.mrb[12].mxu0 }
 0x10f   : > { %v492_v11 = vadd.f32 %v1010_v10, %v892_v37  ;;  %v486_v12 = vpop.f32.mrb[13].mxu0 }
 0x110   : > { %1037 = vmatprep.mubr.msk.f32.mxu1 %vm532_vm1, %v515_v9  ;;  %v487_v13 = vadd.f32 %v892_v37, %v486_v12 }
 0x111   : > { %1038 = vmatmul.mubr.msk.f32.gmra.mrb[10].mxu1 %vm532_vm1, %v516_v8  ;;  %v518_v14 = vmax.f32 %v492_v11, 0.0 }
 0x112   : > { %v517_v15 = vmax.f32 %v487_v13, 0.0  ;;  %v1013_v16 = vpop.f32.mrb[14].mxu0 }
 0x113   : > { %v502_v17 = vadd.f32 %v1013_v16, %v892_v37  ;;  %v496_v18 = vpop.f32.mrb[15].mxu0 }
 0x114   : > { %1040 = vmatprep.mubr.msk.f32.mxu1 %vm532_vm1, %v517_v15  ;;  %v497_v19 = vadd.f32 %v892_v37, %v496_v18 }
 0x115   : > { %1041 = vmatmul.mubr.msk.f32.gmra.mrb[12].mxu1 %vm532_vm1, %v518_v14  ;;  %v520_v20 = vmax.f32 %v502_v17, 0.0 }
 0x116   : > { %v519_v21 = vmax.f32 %v497_v19, 0.0 }
 0x118   : > { %1043 = vmatprep.mubr.msk.f32.mxu1 %vm532_vm1, %v519_v21 }
 0x119   : > { %1044 = vmatmul.mubr.msk.f32.gmra.mrb[14].mxu1 %vm532_vm1, %v520_v20 }
 0x1d0   : > { %v1024_v23 = vpop.f32.mrb[0].mxu1 }
 0x1d1   : > { %v647_v24 = vpop.f32.mrb[1].mxu1  ;;  %v653_v25 = vadd.f32 %v1024_v23, %v1364_v22 }
 0x1d2   : > { %v648_v26 = vadd.f32 %v1364_v22, %v647_v24 }
 0x1d3   : > { %v727_v31 = vmax.f32 %v653_v25, 0.0  ;;  %v810_v25 = vpop.permute.xlu0 %809 }
 0x1d4   : > { %v726_v28 = vmax.f32 %v648_v26, 0.0  ;;  %v1027_v29 = vpop.f32.mrb[2].mxu1 }
 0x1d5   : > { %v657_v30 = vpop.f32.mrb[3].mxu1  ;;  %v750_v36 = vmul.f32 %v1371_v27, %v727_v31  ;;  %v663_v37 = vadd.f32 %v1027_v29, %v1364_v22 }
 0x1d6   : > { %v749_v32 = vmul.f32 %v1371_v27, %v726_v28  ;;  %v658_v33 = vadd.f32 %v1364_v22, %v657_v30 }
 0x1d7   : > { %v729_v41 = vmax.f32 %v663_v37, 0.0 }
 0x1d8   : > { %765 = vxpose.xlu0.b32.start [1/16] (narrow) %v749_v32, 32  ;;  %v1030_v34 = vpop.f32.mrb[4].mxu1  ;;  %v728_v38 = vmax.f32 %v658_v33, 0.0  ;;  %v812_v33 = vlaneseq }
 0x1d9   : > { %v667_v35 = vpop.f32.mrb[5].mxu1  ;;  %v752_v46 = vmul.f32 %v1371_v27, %v729_v41  ;;  %v673_v47 = vadd.f32 %v1030_v34, %v1364_v22 }
 0x1da   : > { %v751_v42 = vmul.f32 %v1371_v27, %v728_v38  ;;  %v668_v43 = vadd.f32 %v1364_v22, %v667_v35  ;;  %v813_v35 = vshrl.u32 %v812_v33, 7 }
 0x1db   : > { %v731_v51 = vmax.f32 %v673_v47, 0.0 }
 0x1dc   : > { %766 = vxpose.xlu0.b32.cont [2/16] (narrow) %v750_v36, 32  ;;  %v1033_v39 = vpop.f32.mrb[6].mxu1  ;;  %v730_v48 = vmax.f32 %v668_v43, 0.0  ;;  %v814_v38 = vsub.s32 0, %v813_v35 }
 0x1dd   : > { %v677_v40 = vpop.f32.mrb[7].mxu1  ;;  %v754_v56 = vmul.f32 %v1371_v27, %v731_v51  ;;  %v683_v57 = vadd.f32 %v1033_v39, %v1364_v22 }
 0x1de   : > { %v753_v52 = vmul.f32 %v1371_v27, %v730_v48  ;;  %v678_v53 = vadd.f32 %v1364_v22, %v677_v40  ;;  %v815_v40 = vrot.slane %v810_v25, %v814_v38 }
 0x1df   : > { %v733_v61 = vmax.f32 %v683_v57, 0.0 }
 0x1e0   : > { %767 = vxpose.xlu0.b32.cont [3/16] (narrow) %v751_v42, 32  ;;  %v1036_v44 = vpop.f32.mrb[8].mxu1  ;;  %v732_v58 = vmax.f32 %v678_v53, 0.0 }
 0x1e1   : > { %v687_v45 = vpop.f32.mrb[9].mxu1  ;;  %v756_v0 = vmul.f32 %v1371_v27, %v733_v61  ;;  %v693_v1 = vadd.f32 %v1036_v44, %v1364_v22 }
 0x1e2   : > { %v755_v62 = vmul.f32 %v1371_v27, %v732_v58  ;;  %v688_v63 = vadd.f32 %v1364_v22, %v687_v45 }
 0x1e3   : > { %v735_v3 = vmax.f32 %v693_v1, 0.0 }
 0x1e4   : > { %768 = vxpose.xlu0.b32.cont [4/16] (narrow) %v752_v46, 32  ;;  %v1039_v49 = vpop.f32.mrb[10].mxu1  ;;  %v734_v2 = vmax.f32 %v688_v63, 0.0 }
 0x1e5   : > { %v697_v50 = vpop.f32.mrb[11].mxu1  ;;  %v758_v6 = vmul.f32 %v1371_v27, %v735_v3  ;;  %v703_v7 = vadd.f32 %v1039_v49, %v1364_v22 }
 0x1e6   : > { %v757_v4 = vmul.f32 %v1371_v27, %v734_v2  ;;  %v698_v5 = vadd.f32 %v1364_v22, %v697_v50 }
 0x1e7   : > { %v737_v9 = vmax.f32 %v703_v7, 0.0 }
 0x1e8   : > { %769 = vxpose.xlu0.b32.cont [5/16] (narrow) %v753_v52, 32  ;;  %v1042_v54 = vpop.f32.mrb[12].mxu1  ;;  %v736_v8 = vmax.f32 %v698_v5, 0.0 }
 0x1e9   : > { %v707_v55 = vpop.f32.mrb[13].mxu1  ;;  %v760_v12 = vmul.f32 %v1371_v27, %v737_v9  ;;  %v713_v13 = vadd.f32 %v1042_v54, %v1364_v22 }
 0x1ea   : > { %v759_v10 = vmul.f32 %v1371_v27, %v736_v8  ;;  %v708_v11 = vadd.f32 %v1364_v22, %v707_v55 }
 0x1eb   : > { %v739_v15 = vmax.f32 %v713_v13, 0.0 }
 0x1ec   : > { %770 = vxpose.xlu0.b32.cont [6/16] (narrow) %v754_v56, 32  ;;  %v1045_v59 = vpop.f32.mrb[14].mxu1  ;;  %v738_v14 = vmax.f32 %v708_v11, 0.0 }
 0x1ed   : > { %v717_v60 = vpop.f32.mrb[15].mxu1  ;;  %v762_v18 = vmul.f32 %v1371_v27, %v739_v15  ;;  %v723_v19 = vadd.f32 %v1045_v59, %v1364_v22 }
 0x1ee   : > { %v761_v16 = vmul.f32 %v1371_v27, %v738_v14  ;;  %v718_v17 = vadd.f32 %v1364_v22, %v717_v60 }
 0x1ef   : > { %v741_v21 = vmax.f32 %v723_v19, 0.0 }
 0x1f0   : > { %771 = vxpose.xlu0.b32.cont [7/16] (narrow) %v755_v62, 32  ;;  %v740_v20 = vmax.f32 %v718_v17, 0.0 }
 0x1f1   : > { %v764_v24 = vmul.f32 %v1371_v27, %v741_v21 }
 0x1f2   : > { %v763_v23 = vmul.f32 %v1371_v27, %v740_v20 }
 0x1f4   : > { %772 = vxpose.xlu0.b32.cont [8/16] (narrow) %v756_v0, 32 }
 0x1f8   : > { %773 = vxpose.xlu0.b32.cont [9/16] (narrow) %v757_v4, 32 }
 0x1fc   : > { %774 = vxpose.xlu0.b32.cont [10/16] (narrow) %v758_v6, 32 }
 0x200   : > { %775 = vxpose.xlu0.b32.cont [11/16] (narrow) %v759_v10, 32 }
 0x204   : > { %776 = vxpose.xlu0.b32.cont [12/16] (narrow) %v760_v12, 32 }
 0x208   : > { %777 = vxpose.xlu0.b32.cont [13/16] (narrow) %v761_v16, 32 }
 0x20c   : > { %778 = vxpose.xlu0.b32.cont [14/16] (narrow) %v762_v18, 32 }
 0x210   : > { %779 = vxpose.xlu0.b32.cont [15/16] (narrow) %v763_v23, 32 }
 0x214   : > { %780 = vxpose.xlu0.b32.end [16/16] (narrow) %v764_v24, 32 }
 0x258   : > { %v781_v26 = vpop.trf.xlu0 }
 0x25c   : > { %v782_v28 = vpop.trf.xlu0 }
 0x25d   : > { %v797_v30 = vadd.f32 %v782_v28, %v781_v26 }
 0x260   : > { %v783_v29 = vpop.trf.xlu0 }
 0x261   : > { %v798_v31 = vadd.f32 %v797_v30, %v783_v29 }
 0x264   : > { %v784_v32 = vpop.trf.xlu0 }
 0x265   : > { %v799_v22 = vadd.f32 %v798_v31, %v784_v32 }
 0x267   : > { %v800_v34 = vrot.slane %v799_v22, 4 }
 0x269   : > { %v801_v36 = vadd.f32 %v800_v34, %v799_v22 }
 0x26b   : > { %v802_v37 = vrot.slane %v801_v36, 2 }
 0x26d   : > { %v803_v39 = vadd.f32 %v802_v37, %v801_v36 }
 0x26f   : > { %v804_v27 = vrot.slane %v803_v39, 1 }
 0x271   : > { %v805_v41 = vadd.f32 %v804_v27, %v803_v39 }
 0x273   : > { %v816_v42 = vadd.f32 %v815_v40, %v805_v41 }
 0x275   : > { %817 = vst [vmem:[%s273_s21] sm:$0x1] %v816_v42 }
 0x276   : > { %1124 = shalt.err (!%p1121_p3)
}
 0x277   : > { %s1125_s20 = scalar_lea.hbm %s1408_s25, 16  ;;  %s1129_s17 = scalar_lea.hbm %s1457_s7, 32 }
 0x278   : > { %p1126_p4 = scmp.ne.s32.totalorder %s1408_s25, %s1125_s20  ;;  %p1130_p9 = scmp.lt.u32.totalorder %s1408_s25, %s1457_s7 }
 0x279   : > { %p1131_p10 = scmp.lt.u32.totalorder %s1129_s17, %s1125_s20  ;;  %p1133_p12 = scmp.lt.u32.totalorder %s1125_s20, %s1408_s25 }
 0x27a   : > { %p1127_p7 = pnand %p1126_p4, %p1255_p5 }
 0x27b   : > { %p1132_p11 = por %p1131_p10, %p1130_p9 }
 0x27c   : > { %p1128_p8 = pneg %p1127_p7 }
 0x27d   : > { %p1134_p13 = por %p1133_p12, %p1132_p11 }
 0x27f   : > { %p1135_p0 = pnand %p1134_p13, %p1128_p8 }
 0x281   : > { %1138 = shalt.err (!%p1135_p0)
}
 0x282   : > { %1070 = dma.vmem_to_hbm [thread:$0]  (%p1255_p5), %s1410_s22, 16, %s1408_s25, %s819_s30  }
 0x283 PF: > { %p1076_p1 = scmp.ge.s32.totalorder %s1173_s29, 2  ;;  %s843_s21 = sand.u32 1, %s1161_s26  }
 0x284   : > { %s844_s23 = scalar_lea.sflag [#allocation4], %s843_s21 }
 0x285   : > { %p1073_p2 = pnand %p1076_p1, %p1259_p6 }
 0x287   : > { %1156 = dma.done.wait (!%p1073_p2), %s844_s23, 16  }
 0x288   : > { %1158 = vsyncadd (!%p1073_p2), %s844_s23, 4294967280  ;;  %p19_p3 = scmp.ge.s32.totalorder %s1243_s8, 4   ;;  %s1460_s26 = smov %s1165_s27 }
 0x289   : > { %s1461_s27 = smov %s1169_s28  ;;  %s1462_s28 = smov %s1253_s11 }
 0x28a   : > { %s1463_s29 = smov %s1243_s8  ;;  %21 = sbr.rel (!%p19_p3) target bundleno = 6 (0x6), region = 83 }
 0x291   :  { %848 = vsyncpa [#allocation4], 1 }
 0x292   :  { %850 = vsyncpa [#allocation4 + $0x1], 1 }

</bundles_post_ra>
